<compile_context>
chip_gen: v6e
topology: v6e:2x2x1
jax: 0.10.0
libtpu: 0.0.40
codegen_flags: <defaults>
</compile_context>

<pallas_src>
import jax
import jax.numpy as jnp
from jax.experimental import pallas as pl
from jax.experimental.pallas import tpu as pltpu


# ----------------------------------------------------------------------------
# Fused decoder kernel: three MXU matmuls + bias, everything VMEM-resident.
# ----------------------------------------------------------------------------
def decoder_kernel(s_ref, t_ref, e_ref, as_ref, at_ref, ae_ref, b_ref, o_ref):
    # s_ref/t_ref: [TB, L], e_ref: [TB, C*L]
    # as_ref/at_ref: [L, P], ae_ref: [C*L, P], b_ref: [1, P], o_ref: [TB, P]
    acc = jnp.dot(s_ref[...], as_ref[...], preferred_element_type=jnp.float32)
    acc = acc + jnp.dot(t_ref[...], at_ref[...], preferred_element_type=jnp.float32)
    acc = acc + jnp.dot(e_ref[...], ae_ref[...], preferred_element_type=jnp.float32)
    o_ref[...] = (acc + b_ref[...]).astype(o_ref.dtype)


def decoder_forward(fused, seasonal, trend, enc_out):
    """Fused decoder forward. seasonal/trend: [B, L, 1]; enc_out: [B, C, L]."""
    b, l, _ = seasonal.shape
    c = enc_out.shape[1]
    p = fused["b"].shape[-1]

    # contiguous (zero-copy) reshapes only -- no concat/transpose glue in HBM
    s2d = seasonal.reshape(b, l)
    t2d = trend.reshape(b, l)
    e2d = enc_out.reshape(b, c * l)

    # Batch tile: full batch when small (single grid step); (8,128)-friendly
    # 256-row tiles once the batch is large enough to shard across cores.
    tile_b = b if b <= 256 else 256
    grid = (pl.cdiv(b, tile_b),)

    row_map = lambda i: (i, 0)               # activations: walk the batch axis
    const_map = lambda i: (0, 0)             # weights stay resident across grid

    flops = 2 * b * l * p * (c + 2) + b * p
    bytes_accessed = 4 * (2 * b * l + b * c * l + (c + 2) * l * p + p + b * p)

    return pl.pallas_call(
        decoder_kernel,
        out_shape=jax.ShapeDtypeStruct((b, p), jnp.float32),
        grid_spec=pltpu.PrefetchScalarGridSpec(
            num_scalar_prefetch=0,
            grid=grid,
            in_specs=[
                pl.BlockSpec((tile_b, l), row_map),
                pl.BlockSpec((tile_b, l), row_map),
                pl.BlockSpec((tile_b, c * l), row_map),
                pl.BlockSpec((l, p), const_map),
                pl.BlockSpec((l, p), const_map),
                pl.BlockSpec((c * l, p), const_map),
                pl.BlockSpec((1, p), const_map),
            ],
            out_specs=pl.BlockSpec((tile_b, p), row_map),
        ),
        compiler_params=pltpu.CompilerParams(
            dimension_semantics=("parallel",)),
        cost_estimate=pl.CostEstimate(
            flops=flops, transcendentals=0, bytes_accessed=bytes_accessed),
    )(s2d, t2d, e2d, fused["A_s"], fused["A_t"], fused["A_e"], fused["b"])


# ----------------------------------------------------------------------------
# Parameter init (deterministic, PyTorch-style uniform(-1/sqrt(fan_in), ...))
# ----------------------------------------------------------------------------
def init_linear(key, in_dim, out_dim):
    k1, k2 = jax.random.split(key)
    bound = 1.0 / jnp.sqrt(jnp.float32(in_dim))
    # stored already transposed: [in_dim, out_dim]
    wt = jax.random.uniform(k1, (in_dim, out_dim), jnp.float32, -bound, bound)
    b = jax.random.uniform(k2, (1, out_dim), jnp.float32, -bound, bound)
    return wt, b


def init_dense(key, in_dim, out_dim):
    k1, k2 = jax.random.split(key)
    w1t, b1 = init_linear(k1, in_dim, in_dim)
    w2t, b2 = init_linear(k2, in_dim, out_dim)
    return {"w1t": w1t, "b1": b1, "w2t": w2t, "b2": b2}


def init_decoder(key, seq_len, pred_len, out_channels):
    out_dim = out_channels + 2
    keys = jax.random.split(key, 9)
    dims_a = [(seq_len, pred_len), (pred_len, pred_len), (pred_len, pred_len)]
    dims_c = [(pred_len * out_dim, pred_len), (pred_len, pred_len), (pred_len, pred_len)]
    dense1 = [init_dense(keys[i], *dims_a[i]) for i in range(3)]
    dense2 = [init_dense(keys[3 + i], *dims_a[i]) for i in range(3)]
    dense3 = [init_dense(keys[6 + i], *dims_c[i]) for i in range(3)]
    return {"dense1": dense1, "dense2": dense2, "dense3": dense3}


# ----------------------------------------------------------------------------
# One-time algebraic folding of the activation-free affine chains
# ----------------------------------------------------------------------------
def _fold_chain(chain):
    """Fold a chain of Dense blocks (2 affine layers each) into one (W, b)."""
    w, b = None, None
    for blk in chain:
        for wt, bias in ((blk["w1t"], blk["b1"]), (blk["w2t"], blk["b2"])):
            if w is None:
                w, b = wt, bias
            else:
                w = w @ wt
                b = b @ wt + bias
    return w, b


def fuse_decoder(params, out_channels, pred_len):
    """Collapse the whole decoder into 3 weight slabs + 1 bias (done once)."""
    c, p = out_channels, pred_len
    w1f, b1f = _fold_chain(params["dense1"])        # [L, P], [1, P]
    w2f, b2f = _fold_chain(params["dense2"])        # [L, P], [1, P]
    w3f, b3f = _fold_chain(params["dense3"])        # [(C+2)*P, P], [1, P]
    # dense3's fused weight splits into per-channel row-chunks of size P,
    # matching torch.cat((target, features), 1) + Flatten row-major ordering:
    # rows [0:P) -> seasonal target, [P:2P) -> trend target, then C channels.
    a_s = w1f @ w3f[0:p]                            # seasonal target path
    a_t = w1f @ w3f[p:2 * p]                        # trend target path
    a_e = jnp.concatenate(
        [w2f @ w3f[(2 + i) * p:(3 + i) * p] for i in range(c)], axis=0)  # [C*L, P]
    b_total = (b1f @ (w3f[0:p] + w3f[p:2 * p])
               + b2f @ w3f[2 * p:].reshape(c, p, p).sum(axis=0)
               + b3f)                               # [1, P]
    return {"A_s": a_s, "A_t": a_t, "A_e": a_e, "b": b_total}


# ----------------------------------------------------------------------------
# Pure-JAX reference (unfolded, mirrors the PyTorch module) for validation
# ----------------------------------------------------------------------------
def dense_block_ref(x, p):
    h = x @ p["w1t"] + p["b1"]          # dropout is identity in eval mode
    return h @ p["w2t"] + p["b2"]


def decoder_ref(params, seasonal, trend, enc_out, pred_len):
    b = seasonal.shape[0]
    data = jnp.transpose(jnp.concatenate([seasonal, trend], axis=2), (0, 2, 1))
    t = data.reshape(b * data.shape[1], -1)
    for p in params["dense1"]:
        t = dense_block_ref(t, p)
    target = t.reshape(b, -1, pred_len)
    f = enc_out.reshape(b * enc_out.shape[1], -1)
    for p in params["dense2"]:
        f = dense_block_ref(f, p)
    features = f.reshape(b, -1, pred_len)
    x = jnp.concatenate([target, features], axis=1).reshape(b, -1)
    for p in params["dense3"]:
        x = dense_block_ref(x, p)
    return x


if __name__ == "__main__":
    # small config consistent with the module
    batch_size = 2
    seq_len = 16
    pred_len = 8
    out_channels = 4          # enc_out channels; out_dim = out_channels + 2 = 6

    key = jax.random.PRNGKey(0)
    kp, ks, kt, ke = jax.random.split(key, 4)

    params = init_decoder(kp, seq_len, pred_len, out_channels)
    fused = fuse_decoder(params, out_channels, pred_len)

    seasonal = jax.random.normal(ks, (batch_size, seq_len, 1), jnp.float32)
    trend = jax.random.normal(kt, (batch_size, seq_len, 1), jnp.float32)
    enc_out = jax.random.normal(ke, (batch_size, out_channels, seq_len), jnp.float32)

    out = decoder_forward(fused, seasonal, trend, enc_out)
    out = jax.block_until_ready(out)

    ref = decoder_ref(params, seasonal, trend, enc_out, pred_len)
    assert out.shape == (batch_size, pred_len), out.shape
    max_err = float(jnp.max(jnp.abs(out - ref)))
    assert jnp.allclose(out, ref, atol=1e-3, rtol=1e-3), ("mismatch vs reference", max_err)

    print("KERNEL_OK")
</pallas_src>

<mosaic_0001>
module attributes {stable_mosaic.version = 11 : i64} {
  func.func @decoder_kernel(%arg0: i32, %arg1: memref<2x16xf32, #tpu.memory_space<vmem>>, %arg2: memref<2x16xf32, #tpu.memory_space<vmem>>, %arg3: memref<2x64xf32, #tpu.memory_space<vmem>>, %arg4: memref<16x8xf32, #tpu.memory_space<vmem>>, %arg5: memref<16x8xf32, #tpu.memory_space<vmem>>, %arg6: memref<64x8xf32, #tpu.memory_space<vmem>>, %arg7: memref<1x8xf32, #tpu.memory_space<vmem>>, %arg8: memref<2x8xf32, #tpu.memory_space<vmem>>) attributes {dimension_semantics = [#tpu.dimension_semantics<parallel>], iteration_bounds = array<i64: 1>, scalar_prefetch = 0 : i64, scratch_operands = 0 : i64, tpu.core_type = #tpu.core_type<tc>, window_params = [{transform_indices = @transform_0, window_bounds = array<i64: 2, 16>}, {transform_indices = @transform_1, window_bounds = array<i64: 2, 16>}, {transform_indices = @transform_2, window_bounds = array<i64: 2, 64>}, {pipeline_mode = #tpu.pipeline_mode<synchronous>, transform_indices = @transform_3, window_bounds = array<i64: 16, 8>}, {pipeline_mode = #tpu.pipeline_mode<synchronous>, transform_indices = @transform_4, window_bounds = array<i64: 16, 8>}, {pipeline_mode = #tpu.pipeline_mode<synchronous>, transform_indices = @transform_5, window_bounds = array<i64: 64, 8>}, {pipeline_mode = #tpu.pipeline_mode<synchronous>, transform_indices = @transform_6, window_bounds = array<i64: 1, 8>}, {transform_indices = @transform_7, window_bounds = array<i64: 2, 8>}]} {
    %c0 = arith.constant 0 : index
    %c0_0 = arith.constant 0 : index
    %0 = vector.load %arg1[%c0, %c0_0] : memref<2x16xf32, #tpu.memory_space<vmem>>, vector<2x16xf32>
    %c0_1 = arith.constant 0 : index
    %c0_2 = arith.constant 0 : index
    %1 = vector.load %arg4[%c0_1, %c0_2] : memref<16x8xf32, #tpu.memory_space<vmem>>, vector<16x8xf32>
    %cst = arith.constant dense<0.000000e+00> : vector<2x8xf32>
    %2 = tpu.matmul %0, %1, %cst {dimension_numbers = #tpu.dot_dimension_numbers<[1], [0], [0], [1], [0, 0, 1, 1], [], []>} : vector<2x16xf32>, vector<16x8xf32>, vector<2x8xf32> -> vector<2x8xf32>
    %c0_3 = arith.constant 0 : index
    %c0_4 = arith.constant 0 : index
    %3 = vector.load %arg2[%c0_3, %c0_4] : memref<2x16xf32, #tpu.memory_space<vmem>>, vector<2x16xf32>
    %c0_5 = arith.constant 0 : index
    %c0_6 = arith.constant 0 : index
    %4 = vector.load %arg5[%c0_5, %c0_6] : memref<16x8xf32, #tpu.memory_space<vmem>>, vector<16x8xf32>
    %cst_7 = arith.constant dense<0.000000e+00> : vector<2x8xf32>
    %5 = tpu.matmul %3, %4, %cst_7 {dimension_numbers = #tpu.dot_dimension_numbers<[1], [0], [0], [1], [0, 0, 1, 1], [], []>} : vector<2x16xf32>, vector<16x8xf32>, vector<2x8xf32> -> vector<2x8xf32>
    %6 = arith.addf %2, %5 : vector<2x8xf32>
    %c0_8 = arith.constant 0 : index
    %c0_9 = arith.constant 0 : index
    %7 = vector.load %arg3[%c0_8, %c0_9] : memref<2x64xf32, #tpu.memory_space<vmem>>, vector<2x64xf32>
    %c0_10 = arith.constant 0 : index
    %c0_11 = arith.constant 0 : index
    %8 = vector.load %arg6[%c0_10, %c0_11] : memref<64x8xf32, #tpu.memory_space<vmem>>, vector<64x8xf32>
    %cst_12 = arith.constant dense<0.000000e+00> : vector<2x8xf32>
    %9 = tpu.matmul %7, %8, %cst_12 {dimension_numbers = #tpu.dot_dimension_numbers<[1], [0], [0], [1], [0, 0, 1, 1], [], []>} : vector<2x64xf32>, vector<64x8xf32>, vector<2x8xf32> -> vector<2x8xf32>
    %10 = arith.addf %6, %9 : vector<2x8xf32>
    %c0_13 = arith.constant 0 : index
    %c0_14 = arith.constant 0 : index
    %11 = vector.load %arg7[%c0_13, %c0_14] : memref<1x8xf32, #tpu.memory_space<vmem>>, vector<1x8xf32>
    %12 = vector.broadcast %11 : vector<1x8xf32> to vector<2x8xf32>
    %13 = arith.addf %10, %12 : vector<2x8xf32>
    %c0_15 = arith.constant 0 : index
    %c0_16 = arith.constant 0 : index
    %14 = vector.load %arg8[%c0_15, %c0_16] : memref<2x8xf32, #tpu.memory_space<vmem>>, vector<2x8xf32>
    tpu.vector_store %arg8[%c0_15, %c0_16], %13 {strides = array<i32>} : memref<2x8xf32, #tpu.memory_space<vmem>>, vector<2x8xf32>,
    return
  }
  func.func @transform_0(%arg0: i32) -> (i32, i32) {
    %c0_i32 = arith.constant 0 : i32
    %c0_i32_0 = arith.constant 0 : i32
    return %arg0, %c0_i32 : i32, i32
  }
  func.func @transform_1(%arg0: i32) -> (i32, i32) {
    %c0_i32 = arith.constant 0 : i32
    %c0_i32_0 = arith.constant 0 : i32
    return %arg0, %c0_i32 : i32, i32
  }
  func.func @transform_2(%arg0: i32) -> (i32, i32) {
    %c0_i32 = arith.constant 0 : i32
    %c0_i32_0 = arith.constant 0 : i32
    return %arg0, %c0_i32 : i32, i32
  }
  func.func @transform_3(%arg0: i32) -> (i32, i32) {
    %c0_i32 = arith.constant 0 : i32
    %c0_i32_0 = arith.constant 0 : i32
    %c0_i32_1 = arith.constant 0 : i32
    return %c0_i32, %c0_i32_0 : i32, i32
  }
  func.func @transform_4(%arg0: i32) -> (i32, i32) {
    %c0_i32 = arith.constant 0 : i32
    %c0_i32_0 = arith.constant 0 : i32
    %c0_i32_1 = arith.constant 0 : i32
    return %c0_i32, %c0_i32_0 : i32, i32
  }
  func.func @transform_5(%arg0: i32) -> (i32, i32) {
    %c0_i32 = arith.constant 0 : i32
    %c0_i32_0 = arith.constant 0 : i32
    %c0_i32_1 = arith.constant 0 : i32
    return %c0_i32, %c0_i32_0 : i32, i32
  }
  func.func @transform_6(%arg0: i32) -> (i32, i32) {
    %c0_i32 = arith.constant 0 : i32
    %c0_i32_0 = arith.constant 0 : i32
    %c0_i32_1 = arith.constant 0 : i32
    return %c0_i32, %c0_i32_0 : i32, i32
  }
  func.func @transform_7(%arg0: i32) -> (i32, i32) {
    %c0_i32 = arith.constant 0 : i32
    %c0_i32_0 = arith.constant 0 : i32
    return %arg0, %c0_i32 : i32, i32
  }
}

</mosaic_0001>

<bundles_post_ra>
// kernel: tpu_custom_call.1
= control target key start
LH: loop header
LB: loop body
LE: loop exit
PB: predicated region body
PF: predicated region fallthrough
CT: control target
= control target key end

     0   :  { %v365_v2 = vmov 0.0   ;;  %vm33_vm0 = vcmask 130048   ;;  %vm366_vm1 = vmmov 0   ;;  %s464_s0 = inlined_call_operand.vmem [shape: f32[2,16], index: 0, kind: input, shape index: {}]   ;;  %s465_s1 = inlined_call_operand.vmem [shape: f32[2,16], index: 1, kind: input, shape index: {}]   ;;  %s466_s2 = inlined_call_operand.vmem [shape: f32[2,64], index: 2, kind: input, shape index: {}]   ;;  %s467_s3 = inlined_call_operand.vmem [shape: f32[16,8], index: 3, kind: input, shape index: {}]   ;;  %s468_s4 = inlined_call_operand.vmem [shape: f32[16,8], index: 4, kind: input, shape index: {}]   ;;  %s469_s5 = inlined_call_operand.vmem [shape: f32[64,8], index: 5, kind: input, shape index: {}]   ;;  %s470_s6 = inlined_call_operand.vmem [shape: f32[1,8], index: 6, kind: input, shape index: {}]   ;;  %s471_s7 = inlined_call_operand.hbm [shape: f32[2,8], index: 7, kind: output, shape index: {}]  }
   0x1   :  { %v188_v0 = vld [vmem:[%s469_s5 + $0x38] sm:$0xff]  ;;  %v32_v1 = vld [vmem:[%s468_s4 + $0x8] sm:$0xff]  ;;  %321 = vmatprep.subr.mxu0 %v365_v2  ;;  %307 = vmatprep.subr.mxu1 %v365_v2  ;;  %v187_v3 = vld [vmem:[%s469_s5 + $0x30] sm:$0xff] }
   0x2   :  { %v31_v4 = vld [vmem:[%s468_s4] sm:$0xff]  ;;  %322 = vmatpush3.msra.mxu0 %v188_v0  ;;  %308 = vmatpush3.msra.mxu1 %v32_v1  ;;  %v186_v5 = vld [vmem:[%s469_s5 + $0x28] sm:$0xff] }
   0x3   :  { %323 = vmatprep.subr.mxu0 %v365_v2  ;;  %309 = vmatprep.subr.mxu1 %v365_v2  ;;  %v30_v6 = vld [vmem:[%s465_s1] sm:$0x3]  ;;  %v29_v7 = vld [vmem:[%s467_s3 + $0x8] sm:$0xff] }
   0x4   :  { %324 = vmatpush3.msra.mxu0 %v187_v3  ;;  %310 = vmatpush3.msra.mxu1 %v31_v4  ;;  %v185_v8 = vld [vmem:[%s469_s5 + $0x20] sm:$0xff] }
   0x5   :  { %325 = vmatprep.subr.mxu0 %v365_v2  ;;  %311 = vmatprep.mubr.msk.f32.mxu1 %vm366_vm1, %v365_v2 }
   0x6   :  { %12 = vsyncpa [#allocation3], 0  ;;  %326 = vmatpush3.msra.mxu0 %v186_v5  ;;  %312 = vmatmul.mubr.msk.f32.vlgmr.msra.gmra.mxu1 %vm33_vm0, %v30_v6  ;;  %v28_v9 = vld [vmem:[%s467_s3] sm:$0xff]  ;;  %v184_v10 = vld [vmem:[%s469_s5 + $0x18] sm:$0xff]  ;;  %vm189_vm2 = vcmask 523264   ;;  %vm272_vm3 = vcmask 58368  }
   0x7   :  { %314 = vmatprep.subr.mxu1 %v365_v2  ;;  %327 = vmatprep.subr.mxu0 %v365_v2  ;;  %v27_v11 = vld [vmem:[%s464_s0] sm:$0x3]  ;;  %v183_v12 = vld [vmem:[%s469_s5 + $0x10] sm:$0xff]  ;;  %v182_v13 = vld [vmem:[%s469_s5 + $0x8] sm:$0xff] }
   0x8   :  { %315 = vmatpush3.msra.mxu1 %v29_v7  ;;  %328 = vmatpush3.msra.mxu0 %v185_v8  ;;  %v181_v14 = vld [vmem:[%s469_s5] sm:$0xff]  ;;  %s367_s5 = smov [#allocation2]  }
   0x9   :  { %316 = vmatprep.subr.mxu1 %v365_v2  ;;  %329 = vmatprep.subr.mxu0 %v365_v2  ;;  %v180_v15 = vld [vmem:[%s466_s2] sm:$0x3]  ;;  %s280_s29 = sshll.u32 %s367_s5, 4  ;;  %s281_s29 = int_to_ptr.vmem [resolvable:$true] %s280_s29 }
   0xa   :  { %317 = vmatpush3.msra.mxu1 %v28_v9  ;;  %318 = vmatprep.mubr.msk.f32.mxu1 %vm366_vm1, %v365_v2  ;;  %v291_v22 = vld [vmem:[%s470_s6] ss:$0 sm:$0xff]  ;;  %s343_s2 = scalar_lea.vmem %s281_s29, 32  ;;  %p348_p1 = scmp.lt.s32.totalorder %s281_s29, %s281_s29 }
   0xb   :  { %330 = vmatpush3.msra.mxu0 %v184_v10  ;;  %319 = vmatmul.mubr.msk.f32.vlgmr.msra.gmra.mxu1 %vm33_vm0, %v27_v11  ;;  %p344_p0 = scmp.ne.s32.totalorder %s281_s29, %s343_s2  ;;  %p349_p2 = scmp.lt.s32.totalorder %s343_s2, %s343_s2 }
   0xc   :  { %331 = vmatprep.subr.mxu0 %v365_v2  ;;  %337 = vmatprep.mubr.msk.f32.mxu0 %vm366_vm1, %v365_v2 }
   0xd   :  { %332 = vmatpush3.msra.mxu0 %v183_v12  ;;  %p350_p3 = por %p349_p2, %p348_p1 }
   0xe   :  { %333 = vmatprep.subr.mxu0 %v365_v2 }
   0xf   :  { %334 = vmatpush3.msra.mxu0 %v182_v13  ;;  %p351_p4 = pnand %p350_p3, %p344_p0 }
  0x10   :  { %335 = vmatprep.subr.mxu0 %v365_v2 }
  0x11   :  { %336 = vmatpush3.msra.mxu0 %v181_v14 }
  0x12   :  { %338 = vmatmul.mubr.msk.f32.vlgmr.msra.gmra.mxu0 %vm189_vm2, %v180_v15 }
  0xc6   :  { %v103_v16 = vpop.f32.mrf.mxu1 }
  0xc8   :  { %v313_v17 = vpop.f32.mrf.mxu1 }
  0xcb   :  { %v176_v18 = vpop.f32.mrf.mxu1 }
  0xcc   :  { %v177_v20 = vadd.f32 %v176_v18, %v103_v16 }
  0xcd   :  { %v320_v19 = vpop.f32.mrf.mxu1 }
  0xd2   :  { %v259_v21 = vpop.f32.mrf.mxu0 }
  0xd3   :  { %v263_v23 = vadd.f32 %v259_v21, %v177_v20 }
  0xd4   :  { %v339_v24 = vpop.f32.mrf.mxu0 }
  0xd5   :  { %v271_v25 = vadd.f32 %v291_v22, %v263_v23 }
  0xd7   :  { %273 = vst.msk [vmem:[#allocation2] sm:$0x3] %vm272_vm3, %v271_v25 }
  0xd8   :  { %354 = shalt.err (!%p351_p4)
}
  0xd9   :  { %283 = dma.vmem_to_hbm [thread:$0]  %s281_s29, 32, %s471_s7, [#allocation3]  }
  0xda   :  { %363 = dma.done.wait [#allocation3], 32  }
  0xdb   :  { %364 = vsyncadd [#allocation3], 4294967264 }
  0xdc   :  { %287 = vsyncpa [#allocation3], 1 }

</bundles_post_ra>
